<compile_context>
chip_gen: v5e
topology: v5e:2x2
jax: 0.10.0
libtpu: 0.0.40
codegen_flags: <defaults>
</compile_context>

<pallas_src>
import functools

import jax
import jax.numpy as jnp
from jax.experimental import pallas as pl
from jax.experimental.pallas import tpu as pltpu


def _round_up(x, m):
    return (x + m - 1) // m * m


_TM_MAX = 256                       # matmul output-tile rows (v6e/v7x MXU width;
                                    # compiler decomposes to 128s on v5e)
_TM_BN_MAX = 512                    # scale/shift block rows (HBM-bound kernel)
_VMEM_LIMIT = 48 * 1024 * 1024      # safe on v7x (64 MiB physical VMEM)


# --------------------------------------------------------------------------
# Pallas kernels
# --------------------------------------------------------------------------
def _mm_bias_kernel(a_ref, b_ref, bias_ref, o_ref, *, relu):
    # bf16 x bf16 -> f32 accumulation on the MXU, fused bias + optional ReLU.
    acc = jnp.dot(a_ref[...], b_ref[...], preferred_element_type=jnp.float32)
    acc = acc + bias_ref[...]                 # (1, Np) broadcasts over (TM, Np)
    if relu:
        acc = jnp.maximum(acc, 0.0)
    o_ref[...] = acc


def _scale_shift_kernel(x_ref, s_ref, t_ref, o_ref):
    o_ref[...] = x_ref[...] * s_ref[...] + t_ref[...]


def matmul_bias(x, wp, bp, relu):
    """y = relu?(x @ wp + bp).

    x : (M, K)   activations (any float dtype, cast to bf16 here)
    wp: (Kp, Np) pre-packed bf16 weight (zero-padded)
    bp: (1, Np)  f32 bias (zero-padded)
    returns (M, Np) f32.
    """
    M, K = x.shape
    Kp, Np = wp.shape
    x = x.astype(jnp.bfloat16)

    TM = _TM_MAX if M >= _TM_MAX else _round_up(M, 8)
    Mp = _round_up(M, TM)
    if M != Mp or K != Kp:
        x = jnp.pad(x, ((0, Mp - M), (0, Kp - K)))

    out = pl.pallas_call(
        functools.partial(_mm_bias_kernel, relu=relu),
        out_shape=jax.ShapeDtypeStruct((Mp, Np), jnp.float32),
        grid_spec=pltpu.PrefetchScalarGridSpec(
            num_scalar_prefetch=0,
            grid=(Mp // TM,),
            in_specs=[
                pl.BlockSpec((TM, Kp), lambda i: (i, 0)),   # A: one M tile
                pl.BlockSpec((Kp, Np), lambda i: (0, 0)),   # W: VMEM-resident
                pl.BlockSpec((1, Np), lambda i: (0, 0)),    # bias: resident
            ],
            out_specs=pl.BlockSpec((TM, Np), lambda i: (i, 0)),
        ),
        compiler_params=pltpu.CompilerParams(
            dimension_semantics=("parallel",),
            vmem_limit_bytes=_VMEM_LIMIT,
        ),
    )(x, wp, bp)
    return out[:M] if Mp != M else out


def scale_shift(x2d, scale, shift):
    """y = x * scale + shift, per-column (channel) scale/shift; x:(M,C) f32."""
    M, C = x2d.shape
    Cp = _round_up(C, 128)
    TM = _TM_BN_MAX if M >= _TM_BN_MAX else _round_up(M, 8)
    Mp = _round_up(M, TM)

    xp = x2d
    if M != Mp or C != Cp:
        xp = jnp.pad(x2d, ((0, Mp - M), (0, Cp - C)))
    sp = jnp.zeros((1, Cp), jnp.float32).at[0, :C].set(scale)
    tp = jnp.zeros((1, Cp), jnp.float32).at[0, :C].set(shift)

    out = pl.pallas_call(
        _scale_shift_kernel,
        out_shape=jax.ShapeDtypeStruct((Mp, Cp), jnp.float32),
        grid_spec=pltpu.PrefetchScalarGridSpec(
            num_scalar_prefetch=0,
            grid=(Mp // TM,),
            in_specs=[
                pl.BlockSpec((TM, Cp), lambda i: (i, 0)),
                pl.BlockSpec((1, Cp), lambda i: (0, 0)),
                pl.BlockSpec((1, Cp), lambda i: (0, 0)),
            ],
            out_specs=pl.BlockSpec((TM, Cp), lambda i: (i, 0)),
        ),
        compiler_params=pltpu.CompilerParams(
            dimension_semantics=("parallel",),
        ),
    )(xp, sp, tp)
    if Mp != M or Cp != C:
        out = out[:M, :C]
    return out


# --------------------------------------------------------------------------
# Weight packing (done once at init)
# --------------------------------------------------------------------------
def pack_conv(w, b):
    """w: (Cout, Cin, kh, kw) PyTorch Conv2d layout -> padded bf16 (Kp, Np)."""
    Cout, Cin, kh, kw = w.shape
    K = kh * kw * Cin
    Wm = jnp.transpose(w, (2, 3, 1, 0)).reshape(K, Cout)   # rows: (i, j, cin)
    Kp, Np = _round_up(K, 128), _round_up(Cout, 128)
    Wp = jnp.zeros((Kp, Np), jnp.bfloat16).at[:K, :Cout].set(Wm.astype(jnp.bfloat16))
    bp = jnp.zeros((1, Np), jnp.float32).at[0, :Cout].set(b.astype(jnp.float32))
    return {'w': Wp, 'b': bp, 'cout': Cout, 'cin': Cin, 'kh': kh, 'kw': kw}


def pack_convT_phases(w, b):
    """w: (Cin, Cout, 4, 4) PyTorch ConvTranspose2d layout.

    Phase decomposition of ConvTranspose2d(k=4, stride=2, pad=1, out_pad=0):
    output pixel (2y+r, 2x+c) is a stride-1 2x2 conv of the (zero-padded by 1)
    input with the sub-kernel  w_eq[:, :, 2*di+r, 2*dj+c],
    where w_eq[co, ci, i, j] = w[ci, co, 3-i, 3-j]  and the tap (di, dj) reads
    the padded input at offset (y + di + r, x + dj + c).
    """
    Cin, Cout, kh, kw = w.shape
    assert kh == 4 and kw == 4
    Np = _round_up(Cout, 128)
    bp = jnp.zeros((1, Np), jnp.float32).at[0, :Cout].set(b.astype(jnp.float32))
    K = 4 * Cin
    Kp = _round_up(K, 128)
    phases = []
    for r in range(2):
        row = []
        for c in range(2):
            taps = []
            for di in range(2):
                for dj in range(2):
                    taps.append(w[:, :, 3 - (2 * di + r), 3 - (2 * dj + c)])  # (Cin,Cout)
            Wm = jnp.stack(taps, axis=0).reshape(K, Cout)    # rows: (di, dj, cin)
            Wp = jnp.zeros((Kp, Np), jnp.bfloat16).at[:K, :Cout].set(
                Wm.astype(jnp.bfloat16))
            row.append(Wp)
        phases.append(row)
    return {'phases': phases, 'b': bp, 'cout': Cout, 'cin': Cin}


# --------------------------------------------------------------------------
# Layer wrappers (im2col glue + Pallas matmul)
# --------------------------------------------------------------------------
def conv2d(x, layer, *, stride=1, padding=0, dilation=1, relu=False):
    """x: (N,H,W,Cin) NHWC; layer: packed conv params."""
    Nb, H, W, Cin = x.shape
    Cout, kh, kw = layer['cout'], layer['kh'], layer['kw']
    Ho = (H + 2 * padding - dilation * (kh - 1) - 1) // stride + 1
    Wo = (W + 2 * padding - dilation * (kw - 1) - 1) // stride + 1

    xb = x.astype(jnp.bfloat16)
    xpad = jnp.pad(xb, ((0, 0), (padding, padding), (padding, padding), (0, 0)))
    if kh == 1 and kw == 1 and stride == 1:
        A = xpad.reshape(Nb * Ho * Wo, Cin)
    else:
        patches = []
        for i in range(kh):
            for j in range(kw):
                hs, ws = i * dilation, j * dilation
                patches.append(
                    xpad[:, hs:hs + stride * (Ho - 1) + 1:stride,
                            ws:ws + stride * (Wo - 1) + 1:stride, :])
        A = jnp.concatenate(patches, axis=-1).reshape(Nb * Ho * Wo, kh * kw * Cin)

    y = matmul_bias(A, layer['w'], layer['b'], relu)
    if y.shape[1] != Cout:
        y = y[:, :Cout]
    return y.reshape(Nb, Ho, Wo, Cout)


def conv_transpose2d(x, layer, *, relu=False):
    """ConvTranspose2d(k=4, stride=2, pad=1) via four stride-1 phase convs."""
    Nb, H, W, Cin = x.shape
    Cout = layer['cout']
    xb = x.astype(jnp.bfloat16)
    xpad = jnp.pad(xb, ((0, 0), (1, 1), (1, 1), (0, 0)))
    out = jnp.zeros((Nb, 2 * H, 2 * W, Cout), jnp.float32)
    for r in range(2):
        for c in range(2):
            taps = []
            for di in range(2):
                for dj in range(2):
                    taps.append(xpad[:, r + di:r + di + H, c + dj:c + dj + W, :])
            A = jnp.concatenate(taps, axis=-1).reshape(Nb * H * W, 4 * Cin)
            y = matmul_bias(A, layer['phases'][r][c], layer['b'], relu)
            if y.shape[1] != Cout:
                y = y[:, :Cout]
            out = out.at[:, r::2, c::2, :].set(y.reshape(Nb, H, W, Cout))
    return out


def batchnorm2d(x, gamma, beta, eps=1e-5):
    """Training-mode BatchNorm2d (batch statistics over N,H,W per channel)."""
    Nb, H, W, C = x.shape
    mean = jnp.mean(x, axis=(0, 1, 2))
    var = jnp.mean(jnp.square(x - mean), axis=(0, 1, 2))    # biased, like torch
    scale = gamma / jnp.sqrt(var + eps)
    shift = beta - mean * scale
    y = scale_shift(x.reshape(Nb * H * W, C), scale, shift)
    return y.reshape(Nb, H, W, C)


# --------------------------------------------------------------------------
# Parameter init (deterministic, synthetic) + one-time packing
# --------------------------------------------------------------------------
def _conv_params(key, cout, cin, k):
    k1, k2 = jax.random.split(key)
    fan_in = cin * k * k
    w = jax.random.normal(k1, (cout, cin, k, k), jnp.float32) * (2.0 / fan_in) ** 0.5
    b = jax.random.normal(k2, (cout,), jnp.float32) * 0.01
    return w, b


def _convT_params(key, cin, cout, k):
    k1, k2 = jax.random.split(key)
    fan_in = cin * k * k
    w = jax.random.normal(k1, (cin, cout, k, k), jnp.float32) * (2.0 / fan_in) ** 0.5
    b = jax.random.normal(k2, (cout,), jnp.float32) * 0.01
    return w, b


def _bn_params(key, c):
    k1, k2 = jax.random.split(key)
    gamma = 1.0 + 0.1 * jax.random.normal(k1, (c,), jnp.float32)
    beta = 0.1 * jax.random.normal(k2, (c,), jnp.float32)
    return gamma, beta


def init_params(key):
    keys = iter(jax.random.split(key, 64))
    p = {}

    def conv(name, cout, cin, k):
        p[name] = pack_conv(*_conv_params(next(keys), cout, cin, k))

    conv('m1_c1', 64, 1, 3)
    conv('m1_c2', 64, 64, 3)
    p['m1_bn'] = _bn_params(next(keys), 64)
    conv('m2_c1', 128, 64, 3)
    conv('m2_c2', 128, 128, 3)
    p['m2_bn'] = _bn_params(next(keys), 128)
    conv('m3_c1', 256, 128, 3)
    conv('m3_c2', 256, 256, 3)
    conv('m3_c3', 256, 256, 3)
    p['m3_bn'] = _bn_params(next(keys), 256)
    conv('m4_c1', 512, 256, 3)
    conv('m4_c2', 512, 512, 3)
    conv('m4_c3', 512, 512, 3)
    p['m4_bn'] = _bn_params(next(keys), 512)
    for m in ('m5', 'm6', 'm7'):
        conv(f'{m}_c1', 512, 512, 3)
        conv(f'{m}_c2', 512, 512, 3)
        conv(f'{m}_c3', 512, 512, 3)
        p[f'{m}_bn'] = _bn_params(next(keys), 512)
    p['m8_ct'] = pack_convT_phases(*_convT_params(next(keys), 512, 256, 4))
    conv('m8_c2', 256, 256, 3)
    conv('m8_c3', 256, 256, 3)
    conv('m8_c4', 313, 256, 1)
    return p


# --------------------------------------------------------------------------
# ECCVGenerator.forward
# --------------------------------------------------------------------------
def eccv_generator_forward(params, input_l_nchw):
    x = jnp.transpose(input_l_nchw, (0, 2, 3, 1))            # NCHW -> NHWC
    # model1
    x = conv2d(x, params['m1_c1'], stride=1, padding=1, relu=True)
    x = conv2d(x, params['m1_c2'], stride=2, padding=1, relu=True)
    x = batchnorm2d(x, *params['m1_bn'])
    # model2
    x = conv2d(x, params['m2_c1'], stride=1, padding=1, relu=True)
    x = conv2d(x, params['m2_c2'], stride=2, padding=1, relu=True)
    x = batchnorm2d(x, *params['m2_bn'])
    # model3
    x = conv2d(x, params['m3_c1'], stride=1, padding=1, relu=True)
    x = conv2d(x, params['m3_c2'], stride=1, padding=1, relu=True)
    x = conv2d(x, params['m3_c3'], stride=2, padding=1, relu=True)
    x = batchnorm2d(x, *params['m3_bn'])
    # model4
    x = conv2d(x, params['m4_c1'], stride=1, padding=1, relu=True)
    x = conv2d(x, params['m4_c2'], stride=1, padding=1, relu=True)
    x = conv2d(x, params['m4_c3'], stride=1, padding=1, relu=True)
    x = batchnorm2d(x, *params['m4_bn'])
    # model5 & model6 (dilated)
    for m in ('m5', 'm6'):
        x = conv2d(x, params[f'{m}_c1'], stride=1, padding=2, dilation=2, relu=True)
        x = conv2d(x, params[f'{m}_c2'], stride=1, padding=2, dilation=2, relu=True)
        x = conv2d(x, params[f'{m}_c3'], stride=1, padding=2, dilation=2, relu=True)
        x = batchnorm2d(x, *params[f'{m}_bn'])
    # model7
    x = conv2d(x, params['m7_c1'], stride=1, padding=1, relu=True)
    x = conv2d(x, params['m7_c2'], stride=1, padding=1, relu=True)
    x = conv2d(x, params['m7_c3'], stride=1, padding=1, relu=True)
    x = batchnorm2d(x, *params['m7_bn'])
    # model8
    x = conv_transpose2d(x, params['m8_ct'], relu=True)
    x = conv2d(x, params['m8_c2'], stride=1, padding=1, relu=True)
    x = conv2d(x, params['m8_c3'], stride=1, padding=1, relu=True)
    x = conv2d(x, params['m8_c4'], stride=1, padding=0, relu=False)   # 1x1 -> 313
    return jnp.transpose(x, (0, 3, 1, 2))                    # NHWC -> NCHW (conv8_3)


if __name__ == "__main__":
    key = jax.random.PRNGKey(0)
    pkey, xkey = jax.random.split(key)
    params = init_params(pkey)
    # Small deterministic input: batch=2, 1 channel (L), 16x16 spatial (NCHW).
    input_l = jax.random.normal(xkey, (2, 1, 16, 16), jnp.float32)

    out = eccv_generator_forward(params, input_l)
    out = jax.block_until_ready(out)

    # 16 -> /2 -> /2 -> /2 -> x2 (transposed conv)  => 4 ; 313 class channels
    assert out.shape == (2, 313, 4, 4), out.shape
    assert bool(jnp.all(jnp.isfinite(out)))
    print("KERNEL_OK")
</pallas_src>

<mosaic_0001>
module attributes {stable_mosaic.version = 11 : i64} {
  func.func @_mm_bias_kernel(%arg0: i32, %arg1: memref<256x128xbf16, #tpu.memory_space<vmem>>, %arg2: memref<128x128xbf16, #tpu.memory_space<vmem>>, %arg3: memref<1x128xf32, #tpu.memory_space<vmem>>, %arg4: memref<256x128xf32, #tpu.memory_space<vmem>>) attributes {dimension_semantics = [#tpu.dimension_semantics<parallel>], iteration_bounds = array<i64: 2>, scalar_prefetch = 0 : i64, scratch_operands = 0 : i64, tpu.core_type = #tpu.core_type<tc>, window_params = [{transform_indices = @transform_0, window_bounds = array<i64: 256, 128>}, {pipeline_mode = #tpu.pipeline_mode<synchronous>, transform_indices = @transform_1, window_bounds = array<i64: 128, 128>}, {pipeline_mode = #tpu.pipeline_mode<synchronous>, transform_indices = @transform_2, window_bounds = array<i64: 1, 128>}, {transform_indices = @transform_3, window_bounds = array<i64: 256, 128>}]} {
    %c0 = arith.constant 0 : index
    %c0_0 = arith.constant 0 : index
    %0 = vector.load %arg1[%c0, %c0_0] : memref<256x128xbf16, #tpu.memory_space<vmem>>, vector<256x128xbf16>
    %c0_1 = arith.constant 0 : index
    %c0_2 = arith.constant 0 : index
    %1 = vector.load %arg2[%c0_1, %c0_2] : memref<128x128xbf16, #tpu.memory_space<vmem>>, vector<128x128xbf16>
    %cst = arith.constant dense<0.000000e+00> : vector<256x128xf32>
    %2 = tpu.matmul %0, %1, %cst {dimension_numbers = #tpu.dot_dimension_numbers<[1], [0], [0], [1], [0, 0, 1, 1], [], []>} : vector<256x128xbf16>, vector<128x128xbf16>, vector<256x128xf32> -> vector<256x128xf32>
    %c0_3 = arith.constant 0 : index
    %c0_4 = arith.constant 0 : index
    %3 = vector.load %arg3[%c0_3, %c0_4] : memref<1x128xf32, #tpu.memory_space<vmem>>, vector<1x128xf32>
    %4 = vector.broadcast %3 : vector<1x128xf32> to vector<256x128xf32>
    %5 = arith.addf %2, %4 : vector<256x128xf32>
    %cst_5 = arith.constant 0.000000e+00 : f32
    %6 = vector.broadcast %cst_5 : f32 to vector<256x128xf32>
    %7 = arith.maximumf %5, %6 : vector<256x128xf32>
    %c0_6 = arith.constant 0 : index
    %c0_7 = arith.constant 0 : index
    %8 = vector.load %arg4[%c0_6, %c0_7] : memref<256x128xf32, #tpu.memory_space<vmem>>, vector<256x128xf32>
    tpu.vector_store %arg4[%c0_6, %c0_7], %7 {strides = array<i32>} : memref<256x128xf32, #tpu.memory_space<vmem>>, vector<256x128xf32>,
    return
  }
  func.func @transform_0(%arg0: i32) -> (i32, i32) {
    %c0_i32 = arith.constant 0 : i32
    %c0_i32_0 = arith.constant 0 : i32
    return %arg0, %c0_i32 : i32, i32
  }
  func.func @transform_1(%arg0: i32) -> (i32, i32) {
    %c0_i32 = arith.constant 0 : i32
    %c0_i32_0 = arith.constant 0 : i32
    %c0_i32_1 = arith.constant 0 : i32
    return %c0_i32, %c0_i32_0 : i32, i32
  }
  func.func @transform_2(%arg0: i32) -> (i32, i32) {
    %c0_i32 = arith.constant 0 : i32
    %c0_i32_0 = arith.constant 0 : i32
    %c0_i32_1 = arith.constant 0 : i32
    return %c0_i32, %c0_i32_0 : i32, i32
  }
  func.func @transform_3(%arg0: i32) -> (i32, i32) {
    %c0_i32 = arith.constant 0 : i32
    %c0_i32_0 = arith.constant 0 : i32
    return %arg0, %c0_i32 : i32, i32
  }
}

</mosaic_0001>

<bundles_post_ra>
// kernel: tpu_custom_call.1
= control target key start
LH: loop header
LB: loop body
LE: loop exit
PB: predicated region body
PF: predicated region fallthrough
CT: control target
= control target key end

     0   :  { %8 = vsyncpa [#allocation3], 0  ;;  %s1274_s0 = inlined_call_operand.hbm [shape: bf16[512,128], index: 0, kind: input, shape index: {}]   ;;  %s1275_s1 = inlined_call_operand.hbm [shape: bf16[128,128], index: 1, kind: input, shape index: {}]   ;;  %s1276_s2 = inlined_call_operand.vmem [shape: f32[1,128], index: 2, kind: input, shape index: {}]   ;;  %s1277_s3 = inlined_call_operand.hbm [shape: f32[512,128], index: 3, kind: output, shape index: {}]  }
   0x1   :  { %10 = vsyncpa [#allocation3 + $0x1], 0 }
   0x2   :  { %11 = vsyncpa [#allocation6], 0 }
   0x3   :  { %12 = vsyncpa [#allocation4], 0 }
   0x4   :  { %14 = vsyncpa [#allocation4 + $0x1], 0  ;;  %s1039_s12 = smov 0   ;;  %s1041_s13 = smov 0  }
   0x5   :  { %s1043_s14 = smov 0   ;;  %s1045_s15 = smov 0  }
   0x6 LB: > { %s1060_s16 = sadd.s32 4294967295, %s1012_s15   ;;  %s658_s17 = sadd.s32 4294967294, %s1012_s15   ;;  %s1012_s15 = sphi %s1045_s15, %s1287_s15   ;;  %s1008_s14 = sphi %s1043_s14, %s1286_s14   ;;  %s1004_s13 = sphi %s1041_s13, %s1285_s13   ;;  %s1000_s12 = sphi %s1039_s12, %s1284_s12  }
   0x7   : > { %p40_p0 = scmp.ne.s32.totalorder %s1004_s13, %s1000_s12  ;;  %p41_p1 = scmp.eq.s32.totalorder %s1060_s16, 0 }
   0x8   : > { %p106_p2 = scmp.eq.s32.totalorder %s1060_s16, 1  ;;  %p112_p3 = scmp.eq.s32.totalorder %s658_s17, 1 }
   0x9   : > { %p1069_p4 = por %p41_p1, %p40_p0  ;;  %p659_p5 = scmp.ge.s32.totalorder %s1012_s15, 1 }
   0xa   : > { %p1074_p6 = por %p112_p3, %p40_p0  ;;  %p119_p7 = scmp.lt.s32.totalorder %s1012_s15, 3 }
   0xb   : > { %s130_s22 = sshll.u32 %s1275_s1, 4  ;;  %s1014_s24 = smov [#allocation5]   ;;  %s131_s22 = int_to_ptr.hbm [resolvable:$true] %s130_s22 }
   0xc   : > { %p1082_p8 = pnand %p659_p5, %p119_p7  ;;  %s132_s25 = sshll.u32 %s1014_s24, 4  ;;  %s133_s25 = int_to_ptr.vmem [resolvable:$true] %s132_s25 }
   0xd   : > { %s1092_s26 = sadd.s32 1, %s1012_s15   ;;  %s1015_s27 = smov 64  }
   0xe   : > { %p828_p9 = pneg %p1082_p8  ;;  %s1016_s28 = smov 4  }
   0xf   : > { %s24_s29 = ssub.s32 %s1012_s15, %s1092_s26  ;;  %s27_s30 = sadd.s32 1, %s1008_s14 }
  0x10   : > { %p829_p10 = pnand %p828_p9, %p41_p1  ;;  %p25_p12 = scmp.eq.s32.totalorder %s24_s29, 0 }
  0x11   : > { %p34_p13 = scmp.ne.s32.totalorder %s1008_s14, %s1004_s13  ;;  %p35_p0 = scmp.eq.s32.totalorder %s1012_s15, 0 }
  0x12   : > { %831 = dma.hbm_to_vmem [thread:$0]  (!%p829_p10), %s131_s22, 1024, %s133_s25, [#allocation6], %s1015_s27, %s1015_s27, %s1016_s28  }
  0x13   : > { %s1104_s4 = scalar_select %p25_p12, %s1008_s14, %s27_s30  }
  0x14   : > { %p1108_p3 = por %p106_p2, %p34_p13  ;;  %p841_p5 = scmp.lt.s32.totalorder %s1012_s15, 2 }
  0x15   : > { %s149_s6 = sand.u32 1, %s1008_s14   ;;  %s770_s7 = sshll.u32 %s1012_s15, 7 }
  0x16   : > { %p36_p7 = por %p35_p0, %p34_p13  ;;  %s662_s8 = sshll.u32 %s149_s6, 7 }
  0x17   : > { %s158_s11 = scalar_lea.hbm %s1274_s0, %s770_s7  ;;  %s153_s20 = scalar_lea.vmem [#allocation2], %s662_s8 }
  0x18   : > { %s159_s17 = sshll.u32 %s158_s11, 4  ;;  %s161_s21 = sshll.u32 %s153_s20, 4  ;;  %s160_s17 = int_to_ptr.hbm [resolvable:$true] %s159_s17  ;;  %s162_s21 = int_to_ptr.vmem [resolvable:$true] %s161_s21 }
  0x19   : > { %p1118_p9 = pnand %p841_p5, %p36_p7  ;;  %s150_s24 = scalar_lea.sflag [#allocation3], %s149_s6 }
  0x1a   : > { %s912_s25 = sshra.s32 %s160_s17, 4  ;;  %s919_s8 = scalar_lea.hbm %s1274_s0, 256  ;;  %s913_s25 = int_to_ptr.hbm [resolvable:$true] %s912_s25 }
  0x1b   : > { %s914_s29 = scalar_lea.hbm %s913_s25, 128  ;;  %p916_p10 = pneg %p1118_p9 }
  0x1c   : > { %p915_p2 = scmp.ne.s32.totalorder %s913_s25, %s914_s29  ;;  %p920_p0 = scmp.lt.s32.totalorder %s913_s25, %s1274_s0 }
  0x1d   : > { %p921_p5 = scmp.lt.s32.totalorder %s919_s8, %s914_s29 }
  0x1e   : > { %p917_p12 = pnand %p916_p10, %p915_p2 }
  0x1f   : > { %p922_p7 = por %p921_p5, %p920_p0 }
  0x20   : > { %p918_p13 = pneg %p917_p12 }
  0x22   : > { %p923_p11 = pnand %p922_p7, %p918_p13 }
  0x24   : > { %926 = shalt.err (!%p923_p11)
}
  0x25   : > { %835 = dma.hbm_to_vmem [thread:$0]  (!%p1118_p9), %s160_s17, 2048, %s162_s21, %s150_s24, %s1015_s27, %s1015_s27, %s1016_s28  }
  0x26   : > { %173 = sbr.rel (%p1082_p8) target bundleno = 276 (0x114), region = 32  ;;  %s1138_s6 = sand.u32 (!%p1082_p8), 1, %s1004_s13  }
  0x27   : > { %s666_s11 = sshll.u32 (!%p1082_p8), %s1138_s6, 7  ;;  %s176_s20 = scalar_lea.sflag (!%p1082_p8), [#allocation3], %s1138_s6 }
  0x28   : > { %s1142_s25 = scalar_lea.vmem (!%p1082_p8), [#allocation2], %s666_s11 }
  0x2b   : > { %987 = dma.done.wait (%p1069_p4), %s176_s20, 2048  }
  0x2c   : > { %989 = vsyncadd (%p1069_p4), %s176_s20, 4294965248 }
  0x2d   : > { %991 = dma.done.wait (%p41_p1), [#allocation6], 1024  }
  0x2e   : > { %993 = vsyncadd (%p41_p1), [#allocation6], 4294966272  ;;  %v794_v0 = vld [vmem:[#allocation5 + $0x38] sm:$0xff]  ;;  %v793_v1 = vld [vmem:[#allocation5 + $0x30] sm:$0xff]  ;;  %s668_s27 = sshll.u32 %s1138_s6, 8  ;;  %s795_s17 = sshll.u32 %s1060_s16, 8 }
  0x2f   : > { %406 = vmatpush.bf16.msra.mxu0 %v794_v0  ;;  %796 = vmatpush.bf16.msra.mxu1 %v794_v0  ;;  %v792_v2 = vld [vmem:[#allocation5 + $0x28] sm:$0xff]  ;;  %v791_v3 = vld [vmem:[#allocation5 + $0x20] sm:$0xff]  ;;  %v790_v4 = vld [vmem:[#allocation5 + $0x18] sm:$0xff]  ;;  %s1176_s28 = scalar_lea.vmem [#allocation7], %s668_s27  ;;  %s571_s24 = scalar_lea.hbm %s1277_s3, %s795_s17 }
  0x30   : > { %797 = vmatpush.bf16.msra.mxu2 %v794_v0  ;;  %798 = vmatpush.bf16.msra.mxu3 %v794_v0  ;;  %v789_v5 = vld [vmem:[#allocation5 + $0x10] sm:$0xff]  ;;  %v788_v6 = vld [vmem:[#allocation5 + $0x8] sm:$0xff]  ;;  %v787_v7 = vld [vmem:[#allocation5] sm:$0xff]  ;;  %s572_s29 = sshll.u32 %s1176_s28, 4  ;;  %s574_s16 = sshll.u32 %s571_s24, 4  ;;  %s573_s29 = int_to_ptr.vmem [resolvable:$true] %s572_s29  ;;  %s575_s16 = int_to_ptr.hbm [resolvable:$true] %s574_s16 }
  0x31   : > { %v771_v8 = vld [vmem:[%s1142_s25] sm:$0xff]  ;;  %v772_v12 = vld [vmem:[%s1142_s25 + $0x8] sm:$0xff]  ;;  %v773_v16 = vld [vmem:[%s1142_s25 + $0x10] sm:$0xff]  ;;  %s560_s30 = scalar_lea.sflag [#allocation4], %s1138_s6  ;;  %s956_s7 = sshra.s32 %s575_s16, 4  ;;  %s957_s7 = int_to_ptr.hbm [resolvable:$true] %s956_s7 }
  0x32   : > { %v775_v9 = vld [vmem:[%s1142_s25 + $0x20] sm:$0xff]  ;;  %v776_v13 = vld [vmem:[%s1142_s25 + $0x28] sm:$0xff]  ;;  %v777_v17 = vld [vmem:[%s1142_s25 + $0x30] sm:$0xff]  ;;  %s958_s8 = scalar_lea.hbm %s957_s7, 256  ;;  %s962_s11 = scalar_lea.hbm %s1277_s3, 512 }
  0x33   : > { %407 = vmatpush.bf16.msra.mxu0 %v793_v1  ;;  %799 = vmatpush.bf16.msra.mxu1 %v793_v1  ;;  %v779_v10 = vld [vmem:[%s1142_s25 + $0x40] sm:$0xff]  ;;  %v780_v14 = vld [vmem:[%s1142_s25 + $0x48] sm:$0xff]  ;;  %v781_v18 = vld [vmem:[%s1142_s25 + $0x50] sm:$0xff]  ;;  %p959_p1 = scmp.ne.s32.totalorder %s957_s7, %s958_s8  ;;  %p963_p11 = scmp.lt.s32.totalorder %s957_s7, %s1277_s3 }
  0x34   : > { %800 = vmatpush.bf16.msra.mxu2 %v793_v1  ;;  %801 = vmatpush.bf16.msra.mxu3 %v793_v1  ;;  %v783_v11 = vld [vmem:[%s1142_s25 + $0x60] sm:$0xff]  ;;  %v784_v15 = vld [vmem:[%s1142_s25 + $0x68] sm:$0xff]  ;;  %v785_v19 = vld [vmem:[%s1142_s25 + $0x70] sm:$0xff]  ;;  %p964_p9 = scmp.lt.s32.totalorder %s962_s11, %s958_s8 }
  0x35   : > { %v774_v20 = vld [vmem:[%s1142_s25 + $0x18] sm:$0xff]  ;;  %v1171_v24 = vld [vmem:[%s1276_s2] ss:$0 sm:$0xff]  ;;  %p960_p4 = pnand %p959_p1, %p1108_p3 }
  0x36   : > { %v778_v21 = vld [vmem:[%s1142_s25 + $0x38] sm:$0xff]  ;;  %p965_p2 = por %p964_p9, %p963_p11 }
  0x37   : > { %408 = vmatpush.bf16.msra.mxu0 %v792_v2  ;;  %802 = vmatpush.bf16.msra.mxu1 %v792_v2  ;;  %v782_v22 = vld [vmem:[%s1142_s25 + $0x58] sm:$0xff]  ;;  %p961_p8 = pneg %p960_p4 }
  0x38   : > { %803 = vmatpush.bf16.msra.mxu2 %v792_v2  ;;  %804 = vmatpush.bf16.msra.mxu3 %v792_v2  ;;  %v786_v23 = vld [vmem:[%s1142_s25 + $0x78] sm:$0xff] }
  0x39   : > { %p966_p10 = pnand %p965_p2, %p961_p8 }
  0x3b   : > { %409 = vmatpush.bf16.msra.mxu0 %v791_v3  ;;  %805 = vmatpush.bf16.msra.mxu1 %v791_v3 }
  0x3c   : > { %806 = vmatpush.bf16.msra.mxu2 %v791_v3  ;;  %807 = vmatpush.bf16.msra.mxu3 %v791_v3 }
  0x3f   : > { %410 = vmatpush.bf16.msra.mxu0 %v790_v4  ;;  %808 = vmatpush.bf16.msra.mxu1 %v790_v4 }
  0x40   : > { %809 = vmatpush.bf16.msra.mxu2 %v790_v4  ;;  %810 = vmatpush.bf16.msra.mxu3 %v790_v4 }
  0x43   : > { %411 = vmatpush.bf16.msra.mxu0 %v789_v5  ;;  %811 = vmatpush.bf16.msra.mxu1 %v789_v5 }
  0x44   : > { %812 = vmatpush.bf16.msra.mxu2 %v789_v5  ;;  %813 = vmatpush.bf16.msra.mxu3 %v789_v5 }
  0x47   : > { %412 = vmatpush.bf16.msra.mxu0 %v788_v6  ;;  %814 = vmatpush.bf16.msra.mxu1 %v788_v6 }
  0x48   : > { %815 = vmatpush.bf16.msra.mxu2 %v788_v6  ;;  %816 = vmatpush.bf16.msra.mxu3 %v788_v6 }
  0x4b   : > { %413 = vmatpush.bf16.msra.mxu0 %v787_v7  ;;  %817 = vmatpush.bf16.msra.mxu1 %v787_v7 }
  0x4c   : > { %818 = vmatpush.bf16.msra.mxu2 %v787_v7  ;;  %819 = vmatpush.bf16.msra.mxu3 %v787_v7 }
  0x4e   : > { %414 = vmatmul.bf16.vlgmr.msra.gmra.mxu0 %v771_v8  ;;  %434 = vmatmul.bf16.vlgmr.msra.gmra.mxu1 %v775_v9 }
  0x4f   : > { %454 = vmatmul.bf16.vlgmr.msra.gmra.mxu2 %v779_v10  ;;  %474 = vmatmul.bf16.vlgmr.msra.gmra.mxu3 %v783_v11 }
  0x5e   : > { %419 = vmatmul.bf16.gmra.mxu0 %v772_v12  ;;  %439 = vmatmul.bf16.gmra.mxu1 %v776_v13 }
  0x5f   : > { %459 = vmatmul.bf16.gmra.mxu2 %v780_v14  ;;  %479 = vmatmul.bf16.gmra.mxu3 %v784_v15 }
  0x6e   : > { %424 = vmatmul.bf16.gmra.mxu0 %v773_v16  ;;  %444 = vmatmul.bf16.gmra.mxu1 %v777_v17 }
  0x6f   : > { %464 = vmatmul.bf16.gmra.mxu2 %v781_v18  ;;  %484 = vmatmul.bf16.gmra.mxu3 %v785_v19 }
  0x7e   : > { %429 = vmatmul.bf16.gmra.mxu0 %v774_v20  ;;  %449 = vmatmul.bf16.gmra.mxu1 %v778_v21 }
  0x7f   : > { %469 = vmatmul.bf16.gmra.mxu2 %v782_v22  ;;  %489 = vmatmul.bf16.gmra.mxu3 %v786_v23 }
  0xcb   : > { %v415_v25 = vpop.f32.mrf.mxu0  ;;  %v435_v26 = vpop.f32.mrf.mxu1 }
  0xcc   : > { %v416_v27 = vadd.f32 %v1171_v24, %v415_v25  ;;  %v436_v28 = vadd.f32 %v1171_v24, %v435_v26 }
  0xce   : > { %v495_v29 = vmax.f32 %v416_v27, 0.0  ;;  %v503_v30 = vmax.f32 %v436_v28, 0.0 }
  0xd0   : > { %527 = vst [vmem:[%s1176_s28] sm:$0xff] %v495_v29 }
  0xd1   : > { %535 = vst [vmem:[%s1176_s28 + $0x40] sm:$0xff] %v503_v30 }
  0xd2   : > { %v455_v31 = vpop.f32.mrf.mxu2  ;;  %v475_v32 = vpop.f32.mrf.mxu3 }
  0xd3   : > { %v456_v33 = vadd.f32 %v1171_v24, %v455_v31  ;;  %v476_v34 = vadd.f32 %v1171_v24, %v475_v32  ;;  %v417_v35 = vpop.f32.mrf.mxu0  ;;  %v437_v36 = vpop.f32.mrf.mxu1 }
  0xd4   : > { %v418_v37 = vadd.f32 %v1171_v24, %v417_v35  ;;  %v438_v38 = vadd.f32 %v1171_v24, %v437_v36 }
  0xd5   : > { %v511_v39 = vmax.f32 %v456_v33, 0.0  ;;  %v519_v40 = vmax.f32 %v476_v34, 0.0 }
  0xd6   : > { %v496_v41 = vmax.f32 %v418_v37, 0.0  ;;  %v504_v42 = vmax.f32 %v438_v38, 0.0 }
  0xd7   : > { %543 = vst [vmem:[%s1176_s28 + $0x80] sm:$0xff] %v511_v39 }
  0xd8   : > { %551 = vst [vmem:[%s1176_s28 + $0xc0] sm:$0xff] %v519_v40 }
  0xd9   : > { %528 = vst [vmem:[%s1176_s28 + $0x8] sm:$0xff] %v496_v41 }
  0xda   : > { %536 = vst [vmem:[%s1176_s28 + $0x48] sm:$0xff] %v504_v42  ;;  %v457_v43 = vpop.f32.mrf.mxu2  ;;  %v477_v44 = vpop.f32.mrf.mxu3 }
  0xdb   : > { %v458_v45 = vadd.f32 %v1171_v24, %v457_v43  ;;  %v478_v46 = vadd.f32 %v1171_v24, %v477_v44  ;;  %v420_v47 = vpop.f32.mrf.mxu0  ;;  %v440_v48 = vpop.f32.mrf.mxu1 }
  0xdc   : > { %v421_v49 = vadd.f32 %v1171_v24, %v420_v47  ;;  %v441_v50 = vadd.f32 %v1171_v24, %v440_v48 }
  0xdd   : > { %v512_v51 = vmax.f32 %v458_v45, 0.0  ;;  %v520_v52 = vmax.f32 %v478_v46, 0.0 }
  0xde   : > { %v497_v53 = vmax.f32 %v421_v49, 0.0  ;;  %v505_v54 = vmax.f32 %v441_v50, 0.0 }
  0xdf   : > { %544 = vst [vmem:[%s1176_s28 + $0x88] sm:$0xff] %v512_v51 }
  0xe0   : > { %552 = vst [vmem:[%s1176_s28 + $0xc8] sm:$0xff] %v520_v52 }
  0xe1   : > { %529 = vst [vmem:[%s1176_s28 + $0x10] sm:$0xff] %v497_v53 }
  0xe2   : > { %537 = vst [vmem:[%s1176_s28 + $0x50] sm:$0xff] %v505_v54  ;;  %v460_v55 = vpop.f32.mrf.mxu2  ;;  %v480_v56 = vpop.f32.mrf.mxu3 }
  0xe3   : > { %v461_v57 = vadd.f32 %v1171_v24, %v460_v55  ;;  %v481_v58 = vadd.f32 %v1171_v24, %v480_v56  ;;  %v422_v59 = vpop.f32.mrf.mxu0  ;;  %v442_v60 = vpop.f32.mrf.mxu1 }
  0xe4   : > { %v423_v61 = vadd.f32 %v1171_v24, %v422_v59  ;;  %v443_v62 = vadd.f32 %v1171_v24, %v442_v60 }
  0xe5   : > { %v513_v63 = vmax.f32 %v461_v57, 0.0  ;;  %v521_v0 = vmax.f32 %v481_v58, 0.0 }
  0xe6   : > { %v498_v1 = vmax.f32 %v423_v61, 0.0  ;;  %v506_v2 = vmax.f32 %v443_v62, 0.0 }
  0xe7   : > { %545 = vst [vmem:[%s1176_s28 + $0x90] sm:$0xff] %v513_v63 }
  0xe8   : > { %553 = vst [vmem:[%s1176_s28 + $0xd0] sm:$0xff] %v521_v0 }
  0xe9   : > { %530 = vst [vmem:[%s1176_s28 + $0x18] sm:$0xff] %v498_v1 }
  0xea   : > { %538 = vst [vmem:[%s1176_s28 + $0x58] sm:$0xff] %v506_v2  ;;  %v462_v3 = vpop.f32.mrf.mxu2  ;;  %v482_v4 = vpop.f32.mrf.mxu3 }
  0xeb   : > { %v463_v5 = vadd.f32 %v1171_v24, %v462_v3  ;;  %v483_v6 = vadd.f32 %v1171_v24, %v482_v4  ;;  %v425_v7 = vpop.f32.mrf.mxu0  ;;  %v445_v8 = vpop.f32.mrf.mxu1 }
  0xec   : > { %v426_v9 = vadd.f32 %v1171_v24, %v425_v7  ;;  %v446_v10 = vadd.f32 %v1171_v24, %v445_v8 }
  0xed   : > { %v514_v11 = vmax.f32 %v463_v5, 0.0  ;;  %v522_v12 = vmax.f32 %v483_v6, 0.0 }
  0xee   : > { %v499_v13 = vmax.f32 %v426_v9, 0.0  ;;  %v507_v14 = vmax.f32 %v446_v10, 0.0 }
  0xef   : > { %546 = vst [vmem:[%s1176_s28 + $0x98] sm:$0xff] %v514_v11 }
  0xf0   : > { %554 = vst [vmem:[%s1176_s28 + $0xd8] sm:$0xff] %v522_v12 }
  0xf1   : > { %531 = vst [vmem:[%s1176_s28 + $0x20] sm:$0xff] %v499_v13 }
  0xf2   : > { %539 = vst [vmem:[%s1176_s28 + $0x60] sm:$0xff] %v507_v14  ;;  %v465_v15 = vpop.f32.mrf.mxu2  ;;  %v485_v16 = vpop.f32.mrf.mxu3 }
  0xf3   : > { %v466_v17 = vadd.f32 %v1171_v24, %v465_v15  ;;  %v486_v18 = vadd.f32 %v1171_v24, %v485_v16  ;;  %v427_v19 = vpop.f32.mrf.mxu0  ;;  %v447_v20 = vpop.f32.mrf.mxu1 }
  0xf4   : > { %v428_v21 = vadd.f32 %v1171_v24, %v427_v19  ;;  %v448_v22 = vadd.f32 %v1171_v24, %v447_v20 }
  0xf5   : > { %v515_v23 = vmax.f32 %v466_v17, 0.0  ;;  %v523_v25 = vmax.f32 %v486_v18, 0.0 }
  0xf6   : > { %v500_v26 = vmax.f32 %v428_v21, 0.0  ;;  %v508_v27 = vmax.f32 %v448_v22, 0.0 }
  0xf7   : > { %547 = vst [vmem:[%s1176_s28 + $0xa0] sm:$0xff] %v515_v23 }
  0xf8   : > { %555 = vst [vmem:[%s1176_s28 + $0xe0] sm:$0xff] %v523_v25 }
  0xf9   : > { %532 = vst [vmem:[%s1176_s28 + $0x28] sm:$0xff] %v500_v26 }
  0xfa   : > { %540 = vst [vmem:[%s1176_s28 + $0x68] sm:$0xff] %v508_v27  ;;  %v467_v28 = vpop.f32.mrf.mxu2  ;;  %v487_v29 = vpop.f32.mrf.mxu3 }
  0xfb   : > { %v468_v30 = vadd.f32 %v1171_v24, %v467_v28  ;;  %v488_v31 = vadd.f32 %v1171_v24, %v487_v29  ;;  %v430_v32 = vpop.f32.mrf.mxu0  ;;  %v450_v33 = vpop.f32.mrf.mxu1 }
  0xfc   : > { %v431_v34 = vadd.f32 %v1171_v24, %v430_v32  ;;  %v451_v35 = vadd.f32 %v1171_v24, %v450_v33 }
  0xfd   : > { %v516_v36 = vmax.f32 %v468_v30, 0.0  ;;  %v524_v37 = vmax.f32 %v488_v31, 0.0 }
  0xfe   : > { %v501_v38 = vmax.f32 %v431_v34, 0.0  ;;  %v509_v39 = vmax.f32 %v451_v35, 0.0 }
  0xff   : > { %548 = vst [vmem:[%s1176_s28 + $0xa8] sm:$0xff] %v516_v36 }
 0x100   : > { %556 = vst [vmem:[%s1176_s28 + $0xe8] sm:$0xff] %v524_v37 }
 0x101   : > { %533 = vst [vmem:[%s1176_s28 + $0x30] sm:$0xff] %v501_v38 }
 0x102   : > { %541 = vst [vmem:[%s1176_s28 + $0x70] sm:$0xff] %v509_v39  ;;  %v470_v40 = vpop.f32.mrf.mxu2  ;;  %v490_v41 = vpop.f32.mrf.mxu3 }
 0x103   : > { %v471_v42 = vadd.f32 %v1171_v24, %v470_v40  ;;  %v491_v43 = vadd.f32 %v1171_v24, %v490_v41  ;;  %v432_v44 = vpop.f32.mrf.mxu0  ;;  %v452_v45 = vpop.f32.mrf.mxu1 }
 0x104   : > { %v433_v46 = vadd.f32 %v1171_v24, %v432_v44  ;;  %v453_v47 = vadd.f32 %v1171_v24, %v452_v45 }
 0x105   : > { %v517_v48 = vmax.f32 %v471_v42, 0.0  ;;  %v525_v49 = vmax.f32 %v491_v43, 0.0 }
 0x106   : > { %v502_v50 = vmax.f32 %v433_v46, 0.0  ;;  %v510_v51 = vmax.f32 %v453_v47, 0.0 }
 0x107   : > { %549 = vst [vmem:[%s1176_s28 + $0xb0] sm:$0xff] %v517_v48 }
 0x108   : > { %557 = vst [vmem:[%s1176_s28 + $0xf0] sm:$0xff] %v525_v49 }
 0x109   : > { %534 = vst [vmem:[%s1176_s28 + $0x38] sm:$0xff] %v502_v50 }
 0x10a   : > { %542 = vst [vmem:[%s1176_s28 + $0x78] sm:$0xff] %v510_v51  ;;  %v472_v52 = vpop.f32.mrf.mxu2  ;;  %v492_v53 = vpop.f32.mrf.mxu3 }
 0x10b   : > { %v473_v54 = vadd.f32 %v1171_v24, %v472_v52  ;;  %v493_v55 = vadd.f32 %v1171_v24, %v492_v53 }
 0x10d   : > { %v518_v56 = vmax.f32 %v473_v54, 0.0  ;;  %v526_v57 = vmax.f32 %v493_v55, 0.0 }
 0x10f   : > { %550 = vst [vmem:[%s1176_s28 + $0xb8] sm:$0xff] %v518_v56 }
 0x110   : > { %558 = vst [vmem:[%s1176_s28 + $0xf8] sm:$0xff] %v526_v57 }
 0x111   : > { %969 = shalt.err (!%p966_p10)
}
 0x112   : > { %s1017_s6 = smov 128   ;;  %s1018_s18 = smov 8  }
 0x113   : > { %826 = dma.vmem_to_hbm [thread:$0]  (%p1108_p3), %s573_s29, 4096, %s575_s16, %s560_s30, %s1017_s6, %s1017_s6, %s1018_s18  }
 0x114 PF: > { %s589_s23 = sand.u32 1, %s1000_s12   ;;  %p1283_p12 = scmp.ge.s32.totalorder %s1012_s15, 2 }
 0x115   : > { %s590_s27 = scalar_lea.sflag [#allocation4], %s589_s23 }
 0x116   : > { %p837_p13 = pnand %p1283_p12, %p1074_p6 }
 0x118   : > { %p838_p0 = pneg %p837_p13 }
 0x11a   : > { %995 = dma.done.wait (%p838_p0), %s590_s27, 4096  }
 0x11b   : > { %997 = vsyncadd (%p838_p0), %s590_s27, 4294963200  ;;  %p17_p5 = scmp.ge.s32.totalorder %s1092_s26, 4   ;;  %s1284_s12 = smov %s1004_s13 }
 0x11c   : > { %s1285_s13 = smov %s1008_s14  ;;  %s1286_s14 = smov %s1104_s4 }
 0x11d   : > { %s1287_s15 = smov %s1092_s26  ;;  %19 = sbr.rel (!%p17_p5) target bundleno = 6 (0x6), region = 81 }
 0x122   :  { %596 = vsyncpa [#allocation3], 1 }
 0x123   :  { %598 = vsyncpa [#allocation3 + $0x1], 1 }
 0x124   :  { %599 = vsyncpa [#allocation6], 1 }
 0x125   :  { %600 = vsyncpa [#allocation4], 1 }
 0x126   :  { %602 = vsyncpa [#allocation4 + $0x1], 1 }

</bundles_post_ra>
